<compile_context>
chip_gen: v5e
topology: v5e:2x2
jax: 0.10.0
libtpu: 0.0.40
codegen_flags: <defaults>
</compile_context>

<pallas_src>
import jax
import jax.numpy as jnp
from jax.experimental import pallas as pl
from jax.experimental.pallas import tpu as pltpu


def _identity_kernel(x_ref, o_ref):
    # Full lane-dense tile pass-through (unmasked vst, whole vregs).
    o_ref[...] = x_ref[...]


def downsample_forward(x):
    """Pallas implementation of DownSample.forward (identity).

    x: (B, C, H, W), NCHW layout (any float dtype).
    """
    orig_shape = x.shape
    n = x.size

    # Pick a lane-dense width (multiple of 128) for the flattened 2D view.
    width = None
    for w in (1024, 512, 256, 128):
        if n % w == 0:
            width = w
            break
    if width is None:
        # Fallback: keep last dim as lanes; blocks will equal full dims.
        # TODO(synk): odd total sizes (not a multiple of 128) stay partially
        # masked on the lane axis; no further compute exists to fuse here.
        width = orig_shape[-1]
        flat = x.reshape(-1, width)
    else:
        flat = x.reshape(-1, width)

    rows = flat.shape[0]
    itemsize = jnp.dtype(flat.dtype).itemsize
    bytes_per_row = width * itemsize

    # Target ~2 MiB per block: big enough to amortize the ~0.35 us/step
    # pipeline overhead, small enough that double-buffered in+out buffers
    # stay well inside v7x's 64 MiB VMEM (and trivially inside v5e/v6e's).
    max_block_bytes = 2 * 1024 * 1024
    tile_rows = max(1, min(rows, max_block_bytes // max(1, bytes_per_row)))
    if tile_rows < rows:
        # Partial tiling: second-minor block dim must be a multiple of 8.
        tile_rows = max(8, (tile_rows // 8) * 8)

    grid = (pl.cdiv(rows, tile_rows),)

    out_flat = pl.pallas_call(
        _identity_kernel,
        out_shape=jax.ShapeDtypeStruct(flat.shape, flat.dtype),
        grid=grid,
        in_specs=[pl.BlockSpec((tile_rows, width), lambda i: (i, 0))],
        out_specs=pl.BlockSpec((tile_rows, width), lambda i: (i, 0)),
        # Identity: let XLA alias input buffer to output (free when donatable,
        # otherwise a single plain copy).
        input_output_aliases={0: 0},
        compiler_params=pltpu.CompilerParams(
            dimension_semantics=("parallel",),
        ),
    )(flat)

    return out_flat.reshape(orig_shape)


if __name__ == "__main__":
    key = jax.random.PRNGKey(0)
    # (batch_size, #channels, height, width) per the module docstring.
    x = jax.random.normal(key, (2, 4, 16, 16), dtype=jnp.float32)

    y = downsample_forward(x)
    jax.block_until_ready(y)

    assert y.shape == x.shape
    assert jnp.allclose(y, x), "identity forward mismatch"
    print("KERNEL_OK")
</pallas_src>

<mosaic_0001>
module attributes {stable_mosaic.version = 11 : i64} {
  func.func @_identity_kernel(%arg0: i32, %arg1: memref<2x1024xf32, #tpu.memory_space<vmem>>, %arg2: memref<2x1024xf32, #tpu.memory_space<vmem>>) attributes {dimension_semantics = [#tpu.dimension_semantics<parallel>], iteration_bounds = array<i64: 1>, scalar_prefetch = 0 : i64, scratch_operands = 0 : i64, tpu.core_type = #tpu.core_type<tc>, window_params = [{transform_indices = @transform_0, window_bounds = array<i64: 2, 1024>}, {transform_indices = @transform_1, window_bounds = array<i64: 2, 1024>}]} {
    %c0 = arith.constant 0 : index
    %c0_0 = arith.constant 0 : index
    %0 = vector.load %arg1[%c0, %c0_0] : memref<2x1024xf32, #tpu.memory_space<vmem>>, vector<2x1024xf32>
    %c0_1 = arith.constant 0 : index
    %c0_2 = arith.constant 0 : index
    %1 = vector.load %arg2[%c0_1, %c0_2] : memref<2x1024xf32, #tpu.memory_space<vmem>>, vector<2x1024xf32>
    tpu.vector_store %arg2[%c0_1, %c0_2], %0 {strides = array<i32>} : memref<2x1024xf32, #tpu.memory_space<vmem>>, vector<2x1024xf32>,
    return
  }
  func.func @transform_0(%arg0: i32) -> (i32, i32) {
    %c0_i32 = arith.constant 0 : i32
    %c0_i32_0 = arith.constant 0 : i32
    return %arg0, %c0_i32 : i32, i32
  }
  func.func @transform_1(%arg0: i32) -> (i32, i32) {
    %c0_i32 = arith.constant 0 : i32
    %c0_i32_0 = arith.constant 0 : i32
    return %arg0, %c0_i32 : i32, i32
  }
}

</mosaic_0001>

<bundles_post_ra>
// kernel: tpu_custom_call.1
= control target key start
LH: loop header
LB: loop body
LE: loop exit
PB: predicated region body
PF: predicated region fallthrough
CT: control target
= control target key end

     0   :  { %6 = vsyncpa [#allocation3], 0  ;;  %s116_s0 = inlined_call_operand.hbm [shape: f32[2,1024], index: 0, kind: input, shape index: {}, may-alias: {0,1}]   ;;  %s117_s1 = inlined_call_operand.hbm [shape: f32[2,1024], index: 1, kind: output, shape index: {}, may-alias: {0,1}]  }
   0x1   :  { %7 = vsyncpa [#allocation4], 0  ;;  %s13_s8 = sshll.u32 %s116_s0, 4  ;;  %s98_s9 = smov [#allocation2]   ;;  %s14_s8 = int_to_ptr.hbm [resolvable:$true] %s13_s8 }
   0x2   :  { %s15_s10 = sshll.u32 %s98_s9, 4  ;;  %s16_s10 = int_to_ptr.vmem [resolvable:$true] %s15_s10 }
   0x3   :  { %18 = dma.hbm_to_vmem [thread:$0]  %s14_s8, 256, %s16_s10, [#allocation3]  }
   0x4   :  { %94 = dma.done.wait [#allocation3], 256  }
   0x5   :  { %95 = vsyncadd [#allocation3], 4294967040  ;;  %s99_s11 = smov [#allocation5]   ;;  %s34_s15 = sshll.u32 %s117_s1, 4  ;;  %v23_v0 = vld [vmem:[#allocation2] sm:$0xff]  ;;  %v24_v1 = vld [vmem:[#allocation2 + $0x8] sm:$0xff]  ;;  %s35_s15 = int_to_ptr.hbm [resolvable:$true] %s34_s15 }
   0x6   :  { %s32_s12 = sshll.u32 %s99_s11, 4  ;;  %25 = vst [vmem:[#allocation5] sm:$0xff] %v23_v0  ;;  %s33_s12 = int_to_ptr.vmem [resolvable:$true] %s32_s12 }
   0x7   :  { %26 = vst [vmem:[#allocation5 + $0x8] sm:$0xff] %v24_v1 }
   0x8   :  { %37 = dma.vmem_to_hbm [thread:$0]  %s33_s12, 256, %s35_s15, [#allocation4]  }
   0x9   :  { %96 = dma.done.wait [#allocation4], 256  }
   0xa   :  { %97 = vsyncadd [#allocation4], 4294967040 }
   0xb   :  { %42 = vsyncpa [#allocation3], 1 }
   0xc   :  { %43 = vsyncpa [#allocation4], 1 }

</bundles_post_ra>
